<compile_context>
chip_gen: v7x
topology: tpu7x:2x2x1
jax: 0.10.0
libtpu: 0.0.40
codegen_flags: <defaults>
</compile_context>

<pallas_src>
import functools
import math

import jax
import jax.numpy as jnp
from jax.experimental import pallas as pl
from jax.experimental.pallas import tpu as pltpu


# --------------------------- Kernel A: QKV + RoPE --------------------------- #

def qkv_rope_kernel(x_ref, wqkv_ref, cos_ref, sin_ref, q_ref, k_ref, v_ref, *,
                    n_heads, d_embed):
    E = d_embed
    H = n_heads
    HE = H * E
    half = E // 2

    x = x_ref[...]                                          # (TS, E) bf16
    # Fused QKV projection, one MXU op, f32 accumulation. attn_scale is folded
    # into the Q weight columns in the wrapper.
    qkv = jnp.dot(x, wqkv_ref[...], preferred_element_type=jnp.float32)

    cos = cos_ref[...]                                      # (TS, E) f32
    sin = sin_ref[...]                                      # (TS, E) f32, sign folded

    def rotate_half(t):
        if E % 128 == 0:
            return pltpu.roll(t, shift=half, axis=-1)       # XLU lane rotate
        # Small-E fallback (test shapes only); concat relayouts are tiny here.
        return jnp.concatenate([t[:, half:], t[:, :half]], axis=-1)

    for h in range(H):                                      # static unroll
        sl = slice(h * E, (h + 1) * E)
        q_h = qkv[:, h * E:(h + 1) * E]                     # f32
        k_h = qkv[:, HE + h * E:HE + (h + 1) * E]           # f32
        q_ref[:, sl] = (q_h * cos + rotate_half(q_h) * sin).astype(q_ref.dtype)
        k_ref[:, sl] = (k_h * cos + rotate_half(k_h) * sin).astype(k_ref.dtype)

    v_ref[...] = qkv[:, 2 * HE:].astype(v_ref.dtype)


# --------------- Kernel B: flash attention + output projection -------------- #

def flash_attn_kernel(q_ref, k_ref, v_ref, wo_ref, o_ref,
                      m_ref, l_ref, acc_ref, *,
                      n_heads, d_embed, block_q, block_kv):
    E = d_embed
    H = n_heads
    i = pl.program_id(1)          # q block index
    j = pl.program_id(2)          # kv block index

    @pl.when(j == 0)
    def _init():
        m_ref[...] = jnp.full(m_ref.shape, -1e30, m_ref.dtype)
        l_ref[...] = jnp.zeros(l_ref.shape, l_ref.dtype)
        acc_ref[...] = jnp.zeros(acc_ref.shape, acc_ref.dtype)

    # Strictly-causal ICL mask => kv blocks with j > i contribute nothing.
    @pl.when(j <= i)
    def _step():
        q = q_ref[...]            # (TQ, HE) bf16 (attn_scale pre-folded)
        k = k_ref[...]            # (TK, HE) bf16
        v = v_ref[...]            # (TK, HE) bf16

        # ICL mask built in-kernel from global indices: allow col < row plus
        # the special (0, 0) entry (so row 0 is never fully masked).
        rows = i * block_q + jax.lax.broadcasted_iota(
            jnp.int32, (block_q, block_kv), 0)
        cols = j * block_kv + jax.lax.broadcasted_iota(
            jnp.int32, (block_q, block_kv), 1)
        allowed = (cols < rows) | ((rows == 0) & (cols == 0))
        bias = jnp.where(allowed, 0.0, -1e30)               # f32 additive mask

        qkT = (((1,), (1,)), ((), ()))                      # q @ k.T, no transpose op
        for h in range(H):                                  # static unroll
            sl = slice(h * E, (h + 1) * E)
            s = jax.lax.dot_general(q[:, sl], k[:, sl], qkT,
                                    preferred_element_type=jnp.float32) + bias
            m_prev = m_ref[:, h:h + 1]                      # (TQ, 1) f32
            l_prev = l_ref[:, h:h + 1]
            m_new = jnp.maximum(m_prev, jnp.max(s, axis=-1, keepdims=True))
            alpha = jnp.exp(m_prev - m_new)
            p = jnp.exp(s - m_new)
            l_ref[:, h:h + 1] = alpha * l_prev + jnp.sum(p, axis=-1, keepdims=True)
            m_ref[:, h:h + 1] = m_new
            acc_ref[:, sl] = alpha * acc_ref[:, sl] + jnp.dot(
                p.astype(v.dtype), v[:, sl], preferred_element_type=jnp.float32)

        # Last contributing kv block for this q block: normalize and project.
        @pl.when(j == i)
        def _finalize():
            for h in range(H):
                sl = slice(h * E, (h + 1) * E)
                acc_ref[:, sl] = acc_ref[:, sl] * pl.reciprocal(
                    l_ref[:, h:h + 1], approx=True)
            out = jnp.dot(acc_ref[...].astype(jnp.bfloat16), wo_ref[...],
                          preferred_element_type=jnp.float32)
            o_ref[...] = out.astype(o_ref.dtype)


# ------------------------------- JAX wrapper -------------------------------- #

def make_rope_tables_rotate_half(S, E, base=10000.0):
    """cos / sign-folded sin tables in the rotate-half (deinterleaved) layout."""
    half = E // 2
    inv_freq = base ** (-(jnp.arange(half, dtype=jnp.float32) * 2.0) / E)
    ang = jnp.arange(S, dtype=jnp.float32)[:, None] * inv_freq[None, :]  # (S, half)
    cos = jnp.concatenate([jnp.cos(ang), jnp.cos(ang)], axis=-1)         # (S, E)
    sin = jnp.concatenate([-jnp.sin(ang), jnp.sin(ang)], axis=-1)        # (S, E)
    return cos, sin


def icl_attention_forward(x, Wq_w, Wk_w, Wv_w, Wo_w, *, n_heads, d_embed,
                          block_s=256, block_q=256, block_kv=256,
                          out_dtype=jnp.bfloat16, rope_base=10000.0):
    B, S, E = x.shape
    assert E == d_embed
    H = n_heads
    HE = H * E
    scale = 1.0 / math.sqrt(d_embed)

    ts = min(block_s, S)
    bq = min(block_q, S)
    bk = min(block_kv, S)
    assert S % ts == 0 and S % bq == 0 and S % bk == 0, "S must divide the tile sizes"
    assert bq == bk, "causal block skipping assumes square q/kv tiles"

    # Per-head deinterleave permutation folded into Wq / Wk rows so the kernel
    # can use rotate-half RoPE (roll + sign) instead of a rotation matmul.
    idx = jnp.concatenate([jnp.arange(0, E, 2), jnp.arange(1, E, 2)])
    row_perm = (jnp.arange(H)[:, None] * E + idx[None, :]).reshape(-1)     # (HE,)

    w_qkv = jnp.concatenate([Wq_w[row_perm].T * scale,      # attn_scale folded into Q
                             Wk_w[row_perm].T,
                             Wv_w.T], axis=1).astype(jnp.bfloat16)         # (E, 3HE)
    w_o = Wo_w.T.astype(jnp.bfloat16)                                      # (HE, E)

    cos, sin = make_rope_tables_rotate_half(S, E, rope_base)               # (S, E) f32
    x_bf16 = x.astype(jnp.bfloat16)

    # ---- Kernel A: fused QKV projection + RoPE, tiled over (B, S) ---------- #
    qkv_kern = functools.partial(qkv_rope_kernel, n_heads=H, d_embed=E)
    q, k, v = pl.pallas_call(
        qkv_kern,
        out_shape=(jax.ShapeDtypeStruct((B, S, HE), jnp.bfloat16),
                   jax.ShapeDtypeStruct((B, S, HE), jnp.bfloat16),
                   jax.ShapeDtypeStruct((B, S, HE), jnp.bfloat16)),
        grid_spec=pltpu.PrefetchScalarGridSpec(
            num_scalar_prefetch=0,
            grid=(B, S // ts),
            in_specs=[
                pl.BlockSpec((None, ts, E), lambda b, i: (b, i, 0)),     # x
                pl.BlockSpec((E, 3 * HE), lambda b, i: (0, 0)),          # W_qkv
                pl.BlockSpec((ts, E), lambda b, i: (i, 0)),              # cos
                pl.BlockSpec((ts, E), lambda b, i: (i, 0)),              # sin (signed)
            ],
            out_specs=(
                pl.BlockSpec((None, ts, HE), lambda b, i: (b, i, 0)),    # q (scaled, roped)
                pl.BlockSpec((None, ts, HE), lambda b, i: (b, i, 0)),    # k (roped)
                pl.BlockSpec((None, ts, HE), lambda b, i: (b, i, 0)),    # v
            ),
        ),
        compiler_params=pltpu.CompilerParams(
            dimension_semantics=("parallel", "parallel"),
            vmem_limit_bytes=48 * 1024 * 1024),
    )(x_bf16, w_qkv, cos, sin)

    # ---- Kernel B: flash attention + output projection --------------------- #
    attn_kern = functools.partial(flash_attn_kernel, n_heads=H, d_embed=E,
                                  block_q=bq, block_kv=bk)
    out = pl.pallas_call(
        attn_kern,
        out_shape=jax.ShapeDtypeStruct((B, S, E), out_dtype),
        grid_spec=pltpu.PrefetchScalarGridSpec(
            num_scalar_prefetch=0,
            grid=(B, S // bq, S // bk),
            in_specs=[
                pl.BlockSpec((None, bq, HE), lambda b, i, j: (b, i, 0)),
                # clamp kv block to <= q block: fully-masked blocks reuse the
                # already-fetched block (no redundant DMA) and are compute-skipped.
                pl.BlockSpec((None, bk, HE),
                             lambda b, i, j: (b, jnp.minimum(i, j), 0)),
                pl.BlockSpec((None, bk, HE),
                             lambda b, i, j: (b, jnp.minimum(i, j), 0)),
                pl.BlockSpec((HE, E), lambda b, i, j: (0, 0)),           # W_o
            ],
            out_specs=pl.BlockSpec((None, bq, E), lambda b, i, j: (b, i, 0)),
            scratch_shapes=[
                pltpu.VMEM((bq, H), jnp.float32),      # running max m
                pltpu.VMEM((bq, H), jnp.float32),      # running denom l
                pltpu.VMEM((bq, HE), jnp.float32),     # per-head acc (fused layout)
            ],
        ),
        compiler_params=pltpu.CompilerParams(
            dimension_semantics=("parallel", "parallel", "arbitrary"),
            vmem_limit_bytes=48 * 1024 * 1024),
    )(q, k, v, w_o)
    return out


# ------------------------------ Pure-JAX reference --------------------------- #

def make_rope_tables_interleaved(S, E, base=10000.0):
    half = E // 2
    inv_freq = base ** (-(jnp.arange(half, dtype=jnp.float32) * 2.0) / E)
    pos = jnp.arange(S, dtype=jnp.float32)
    ang = pos[:, None] * inv_freq[None, :]                    # (S, half)
    cos = jnp.repeat(jnp.cos(ang), 2, axis=-1)                # (S, E)
    sin = jnp.repeat(jnp.sin(ang), 2, axis=-1)
    return cos, sin


def reference_forward(x, Wq_w, Wk_w, Wv_w, Wo_w, *, n_heads, d_embed):
    """Pure-JAX f32 mirror of the PyTorch forward (eval mode, self-attention)."""
    B, S, E = x.shape
    scale = 1.0 / math.sqrt(d_embed)
    q = (x @ Wq_w.T).reshape(B, S, n_heads, E).transpose(0, 2, 1, 3)
    k = (x @ Wk_w.T).reshape(B, S, n_heads, E).transpose(0, 2, 1, 3)
    v = (x @ Wv_w.T).reshape(B, S, n_heads, E).transpose(0, 2, 1, 3)

    cos, sin = make_rope_tables_interleaved(S, E)
    c = cos[:, 0::2]
    s_ = sin[:, 0::2]

    def rope(t):
        t2 = t.reshape(B, n_heads, S, E // 2, 2)
        a, b = t2[..., 0], t2[..., 1]
        r1 = a * c - b * s_
        r2 = a * s_ + b * c
        return jnp.stack([r1, r2], axis=-1).reshape(B, n_heads, S, E)

    q = rope(q)
    k = rope(k)

    i = jnp.arange(S)[:, None]
    j = jnp.arange(S)[None, :]
    mask = (j >= i)
    mask = mask.at[0, 0].set(False)

    s = jnp.einsum("bhse,bhte->bhst", q, k) * scale
    s = jnp.where(mask, -jnp.inf, s)
    p = jax.nn.softmax(s, axis=-1)
    o = jnp.einsum("bhst,bhte->bhse", p, v)
    o = o.transpose(0, 2, 1, 3).reshape(B, S, n_heads * E)
    return o @ Wo_w.T


# ----------------------------------- main ------------------------------------ #

if __name__ == "__main__":
    # small config
    B, S = 2, 8
    d_embed = 32
    n_heads = 2
    H, E = n_heads, d_embed

    key = jax.random.PRNGKey(0)
    kx, kq, kk, kv, ko = jax.random.split(key, 5)

    x = jax.random.normal(kx, (B, S, E), dtype=jnp.float32)

    # PyTorch Linear weight shapes: (out_features, in_features), no bias.
    bound = 1.0 / math.sqrt(E)
    Wq_w = jax.random.uniform(kq, (H * E, E), jnp.float32, -bound, bound)
    Wk_w = jax.random.uniform(kk, (H * E, E), jnp.float32, -bound, bound)
    Wv_w = jax.random.uniform(kv, (H * E, E), jnp.float32, -bound, bound)
    Wo_w = jax.random.uniform(ko, (E, H * E), jnp.float32, -bound, bound)

    out = icl_attention_forward(x, Wq_w, Wk_w, Wv_w, Wo_w,
                                n_heads=n_heads, d_embed=d_embed)
    out = jax.block_until_ready(out)

    ref = reference_forward(x, Wq_w, Wk_w, Wv_w, Wo_w,
                            n_heads=n_heads, d_embed=d_embed)
    assert out.shape == (B, S, E)
    # bf16 matmul inputs / bf16 output (f32 accumulation in-kernel) -> loose tol.
    assert jnp.allclose(out.astype(jnp.float32), ref, rtol=3e-2, atol=3e-2), \
        "mismatch vs JAX reference"

    print("KERNEL_OK")
</pallas_src>

<mosaic_0001>
module attributes {stable_mosaic.version = 11 : i64} {
  func.func @qkv_rope_kernel(%arg0: i32, %arg1: i32, %arg2: memref<1x8x32xbf16, #tpu.memory_space<vmem>>, %arg3: memref<32x192xbf16, #tpu.memory_space<vmem>>, %arg4: memref<8x32xf32, #tpu.memory_space<vmem>>, %arg5: memref<8x32xf32, #tpu.memory_space<vmem>>, %arg6: memref<1x8x64xbf16, #tpu.memory_space<vmem>>, %arg7: memref<1x8x64xbf16, #tpu.memory_space<vmem>>, %arg8: memref<1x8x64xbf16, #tpu.memory_space<vmem>>) attributes {dimension_semantics = [#tpu.dimension_semantics<parallel>, #tpu.dimension_semantics<parallel>], iteration_bounds = array<i64: 2, 1>, scalar_prefetch = 0 : i64, scratch_operands = 0 : i64, tpu.core_type = #tpu.core_type<tc>, window_params = [{transform_indices = @transform_0, window_bounds = array<i64: 1, 8, 32>}, {pipeline_mode = #tpu.pipeline_mode<synchronous>, transform_indices = @transform_1, window_bounds = array<i64: 32, 192>}, {transform_indices = @transform_2, window_bounds = array<i64: 8, 32>}, {transform_indices = @transform_3, window_bounds = array<i64: 8, 32>}, {transform_indices = @transform_4, window_bounds = array<i64: 1, 8, 64>}, {transform_indices = @transform_5, window_bounds = array<i64: 1, 8, 64>}, {transform_indices = @transform_6, window_bounds = array<i64: 1, 8, 64>}]} {
    %c0 = arith.constant 0 : index
    %c0_0 = arith.constant 0 : index
    %c0_1 = arith.constant 0 : index
    %0 = vector.load %arg2[%c0, %c0_0, %c0_1] : memref<1x8x32xbf16, #tpu.memory_space<vmem>>, vector<1x8x32xbf16>
    %1 = vector.shape_cast %0 : vector<1x8x32xbf16> to vector<8x32xbf16>
    %c0_2 = arith.constant 0 : index
    %c0_3 = arith.constant 0 : index
    %2 = vector.load %arg3[%c0_2, %c0_3] : memref<32x192xbf16, #tpu.memory_space<vmem>>, vector<32x192xbf16>
    %cst = arith.constant dense<0.000000e+00> : vector<8x192xf32>
    %3 = tpu.matmul %1, %2, %cst {dimension_numbers = #tpu.dot_dimension_numbers<[1], [0], [0], [1], [0, 0, 1, 1], [], []>} : vector<8x32xbf16>, vector<32x192xbf16>, vector<8x192xf32> -> vector<8x192xf32>
    %c0_4 = arith.constant 0 : index
    %c0_5 = arith.constant 0 : index
    %4 = vector.load %arg4[%c0_4, %c0_5] : memref<8x32xf32, #tpu.memory_space<vmem>>, vector<8x32xf32>
    %c0_6 = arith.constant 0 : index
    %c0_7 = arith.constant 0 : index
    %5 = vector.load %arg5[%c0_6, %c0_7] : memref<8x32xf32, #tpu.memory_space<vmem>>, vector<8x32xf32>
    %6 = vector.extract_strided_slice %3 {offsets = [0, 0], sizes = [8, 32], strides = [1, 1]} : vector<8x192xf32> to vector<8x32xf32>
    %7 = vector.extract_strided_slice %3 {offsets = [0, 64], sizes = [8, 32], strides = [1, 1]} : vector<8x192xf32> to vector<8x32xf32>
    %8 = arith.mulf %6, %4 : vector<8x32xf32>
    %9 = vector.extract_strided_slice %6 {offsets = [0, 16], sizes = [8, 16], strides = [1, 1]} : vector<8x32xf32> to vector<8x16xf32>
    %10 = vector.extract_strided_slice %6 {offsets = [0, 0], sizes = [8, 16], strides = [1, 1]} : vector<8x32xf32> to vector<8x16xf32>
    %11 = tpu.concatenate %9, %10 in 1 : vector<8x16xf32>, vector<8x16xf32> -> vector<8x32xf32>
    %12 = arith.mulf %11, %5 : vector<8x32xf32>
    %13 = arith.addf %8, %12 : vector<8x32xf32>
    %14 = arith.truncf %13 : vector<8x32xf32> to vector<8x32xbf16>
    %c0_8 = arith.constant 0 : index
    %c0_9 = arith.constant 0 : index
    %c0_10 = arith.constant 0 : index
    %15 = vector.load %arg6[%c0_8, %c0_9, %c0_10] : memref<1x8x64xbf16, #tpu.memory_space<vmem>>, vector<1x8x32xbf16>
    %16 = vector.shape_cast %15 : vector<1x8x32xbf16> to vector<8x32xbf16>
    %17 = vector.shape_cast %14 : vector<8x32xbf16> to vector<1x8x32xbf16>
    tpu.vector_store %arg6[%c0_8, %c0_9, %c0_10], %17 {strides = array<i32>} : memref<1x8x64xbf16, #tpu.memory_space<vmem>>, vector<1x8x32xbf16>,
    %18 = arith.mulf %7, %4 : vector<8x32xf32>
    %19 = vector.extract_strided_slice %7 {offsets = [0, 16], sizes = [8, 16], strides = [1, 1]} : vector<8x32xf32> to vector<8x16xf32>
    %20 = vector.extract_strided_slice %7 {offsets = [0, 0], sizes = [8, 16], strides = [1, 1]} : vector<8x32xf32> to vector<8x16xf32>
    %21 = tpu.concatenate %19, %20 in 1 : vector<8x16xf32>, vector<8x16xf32> -> vector<8x32xf32>
    %22 = arith.mulf %21, %5 : vector<8x32xf32>
    %23 = arith.addf %18, %22 : vector<8x32xf32>
    %24 = arith.truncf %23 : vector<8x32xf32> to vector<8x32xbf16>
    %c0_11 = arith.constant 0 : index
    %c0_12 = arith.constant 0 : index
    %c0_13 = arith.constant 0 : index
    %25 = vector.load %arg7[%c0_11, %c0_12, %c0_13] : memref<1x8x64xbf16, #tpu.memory_space<vmem>>, vector<1x8x32xbf16>
    %26 = vector.shape_cast %25 : vector<1x8x32xbf16> to vector<8x32xbf16>
    %27 = vector.shape_cast %24 : vector<8x32xbf16> to vector<1x8x32xbf16>
    tpu.vector_store %arg7[%c0_11, %c0_12, %c0_13], %27 {strides = array<i32>} : memref<1x8x64xbf16, #tpu.memory_space<vmem>>, vector<1x8x32xbf16>,
    %28 = vector.extract_strided_slice %3 {offsets = [0, 32], sizes = [8, 32], strides = [1, 1]} : vector<8x192xf32> to vector<8x32xf32>
    %29 = vector.extract_strided_slice %3 {offsets = [0, 96], sizes = [8, 32], strides = [1, 1]} : vector<8x192xf32> to vector<8x32xf32>
    %30 = arith.mulf %28, %4 : vector<8x32xf32>
    %31 = vector.extract_strided_slice %28 {offsets = [0, 16], sizes = [8, 16], strides = [1, 1]} : vector<8x32xf32> to vector<8x16xf32>
    %32 = vector.extract_strided_slice %28 {offsets = [0, 0], sizes = [8, 16], strides = [1, 1]} : vector<8x32xf32> to vector<8x16xf32>
    %33 = tpu.concatenate %31, %32 in 1 : vector<8x16xf32>, vector<8x16xf32> -> vector<8x32xf32>
    %34 = arith.mulf %33, %5 : vector<8x32xf32>
    %35 = arith.addf %30, %34 : vector<8x32xf32>
    %36 = arith.truncf %35 : vector<8x32xf32> to vector<8x32xbf16>
    %c0_14 = arith.constant 0 : index
    %c0_15 = arith.constant 0 : index
    %c32 = arith.constant 32 : index
    %37 = vector.load %arg6[%c0_14, %c0_15, %c32] : memref<1x8x64xbf16, #tpu.memory_space<vmem>>, vector<1x8x32xbf16>
    %38 = vector.shape_cast %37 : vector<1x8x32xbf16> to vector<8x32xbf16>
    %39 = vector.shape_cast %36 : vector<8x32xbf16> to vector<1x8x32xbf16>
    tpu.vector_store %arg6[%c0_14, %c0_15, %c32], %39 {strides = array<i32>} : memref<1x8x64xbf16, #tpu.memory_space<vmem>>, vector<1x8x32xbf16>,
    %40 = arith.mulf %29, %4 : vector<8x32xf32>
    %41 = vector.extract_strided_slice %29 {offsets = [0, 16], sizes = [8, 16], strides = [1, 1]} : vector<8x32xf32> to vector<8x16xf32>
    %42 = vector.extract_strided_slice %29 {offsets = [0, 0], sizes = [8, 16], strides = [1, 1]} : vector<8x32xf32> to vector<8x16xf32>
    %43 = tpu.concatenate %41, %42 in 1 : vector<8x16xf32>, vector<8x16xf32> -> vector<8x32xf32>
    %44 = arith.mulf %43, %5 : vector<8x32xf32>
    %45 = arith.addf %40, %44 : vector<8x32xf32>
    %46 = arith.truncf %45 : vector<8x32xf32> to vector<8x32xbf16>
    %c0_16 = arith.constant 0 : index
    %c0_17 = arith.constant 0 : index
    %c32_18 = arith.constant 32 : index
    %47 = vector.load %arg7[%c0_16, %c0_17, %c32_18] : memref<1x8x64xbf16, #tpu.memory_space<vmem>>, vector<1x8x32xbf16>
    %48 = vector.shape_cast %47 : vector<1x8x32xbf16> to vector<8x32xbf16>
    %49 = vector.shape_cast %46 : vector<8x32xbf16> to vector<1x8x32xbf16>
    tpu.vector_store %arg7[%c0_16, %c0_17, %c32_18], %49 {strides = array<i32>} : memref<1x8x64xbf16, #tpu.memory_space<vmem>>, vector<1x8x32xbf16>,
    %50 = vector.extract_strided_slice %3 {offsets = [0, 128], sizes = [8, 64], strides = [1, 1]} : vector<8x192xf32> to vector<8x64xf32>
    %51 = arith.truncf %50 : vector<8x64xf32> to vector<8x64xbf16>
    %c0_19 = arith.constant 0 : index
    %c0_20 = arith.constant 0 : index
    %c0_21 = arith.constant 0 : index
    %52 = vector.load %arg8[%c0_19, %c0_20, %c0_21] : memref<1x8x64xbf16, #tpu.memory_space<vmem>>, vector<1x8x64xbf16>
    %53 = vector.shape_cast %52 : vector<1x8x64xbf16> to vector<8x64xbf16>
    %54 = vector.shape_cast %51 : vector<8x64xbf16> to vector<1x8x64xbf16>
    tpu.vector_store %arg8[%c0_19, %c0_20, %c0_21], %54 {strides = array<i32>} : memref<1x8x64xbf16, #tpu.memory_space<vmem>>, vector<1x8x64xbf16>,
    return
  }
  func.func @transform_0(%arg0: i32, %arg1: i32) -> (i32, i32, i32) {
    %c0_i32 = arith.constant 0 : i32
    %c0_i32_0 = arith.constant 0 : i32
    return %arg0, %arg1, %c0_i32 : i32, i32, i32
  }
  func.func @transform_1(%arg0: i32, %arg1: i32) -> (i32, i32) {
    %c0_i32 = arith.constant 0 : i32
    %c0_i32_0 = arith.constant 0 : i32
    %c0_i32_1 = arith.constant 0 : i32
    return %c0_i32, %c0_i32_0 : i32, i32
  }
  func.func @transform_2(%arg0: i32, %arg1: i32) -> (i32, i32) {
    %c0_i32 = arith.constant 0 : i32
    %c0_i32_0 = arith.constant 0 : i32
    return %arg1, %c0_i32 : i32, i32
  }
  func.func @transform_3(%arg0: i32, %arg1: i32) -> (i32, i32) {
    %c0_i32 = arith.constant 0 : i32
    %c0_i32_0 = arith.constant 0 : i32
    return %arg1, %c0_i32 : i32, i32
  }
  func.func @transform_4(%arg0: i32, %arg1: i32) -> (i32, i32, i32) {
    %c0_i32 = arith.constant 0 : i32
    %c0_i32_0 = arith.constant 0 : i32
    return %arg0, %arg1, %c0_i32 : i32, i32, i32
  }
  func.func @transform_5(%arg0: i32, %arg1: i32) -> (i32, i32, i32) {
    %c0_i32 = arith.constant 0 : i32
    %c0_i32_0 = arith.constant 0 : i32
    return %arg0, %arg1, %c0_i32 : i32, i32, i32
  }
  func.func @transform_6(%arg0: i32, %arg1: i32) -> (i32, i32, i32) {
    %c0_i32 = arith.constant 0 : i32
    %c0_i32_0 = arith.constant 0 : i32
    return %arg0, %arg1, %c0_i32 : i32, i32, i32
  }
}

</mosaic_0001>

<bundles_post_ra>
// kernel: tpu_custom_call.1
= control target key start
LH: loop header
LB: loop body
LE: loop exit
PB: predicated region body
PF: predicated region fallthrough
CT: control target
= control target key end

     0   :  { %12 = vsyncpa [#allocation3], 0  ;;  %s1503_s0 = inlined_call_operand.hbm [shape: bf16[2,8,32], index: 0, kind: input, shape index: {}]   ;;  %s1504_s1 = inlined_call_operand.hbm [shape: bf16[32,192], index: 1, kind: input, shape index: {}]   ;;  %s1505_s2 = inlined_call_operand.hbm [shape: f32[8,32], index: 2, kind: input, shape index: {}]   ;;  %s1506_s3 = inlined_call_operand.vmem [shape: f32[8,32], index: 3, kind: input, shape index: {}]   ;;  %s1507_s4 = inlined_call_operand.hbm [shape: bf16[2,8,64], index: 4, kind: output, shape index: {0}]   ;;  %s1508_s5 = inlined_call_operand.hbm [shape: bf16[2,8,64], index: 5, kind: output, shape index: {1}]   ;;  %s1509_s6 = inlined_call_operand.hbm [shape: bf16[2,8,64], index: 6, kind: output, shape index: {2}]  }
   0x1   :  { %14 = vsyncpa [#allocation3 + $0x1], 0 }
   0x2   :  { %15 = vsyncpa [#allocation6], 0 }
   0x3   :  { %16 = vsyncpa [#allocation4], 0 }
   0x4   :  { %18 = vsyncpa [#allocation4 + $0x1], 0 }
   0x5   :  { %19 = vsyncpa [#allocation10], 0 }
   0x6   :  { %21 = vsyncpa [#allocation10 + $0x1], 0  ;;  %s1166_s21 = smov 0   ;;  %s1168_s22 = smov 0  }
   0x7   :  { %s1170_s23 = smov 0   ;;  %s1172_s24 = smov 0  }
   0x8   :  { %s1174_s25 = smov 0   ;;  %s1176_s26 = smov 0  }
   0x9 LB: > { %s1197_s27 = sadd.s32 4294967295, %s1113_s26   ;;  %s1511_s28 = sadd.s32 4294967294, %s1113_s26   ;;  %s1113_s26 = sphi %s1176_s26, %s27_s26   ;;  %s1109_s25 = sphi %s1174_s25, %s1532_s25   ;;  %s1105_s24 = sphi %s1172_s24, %s1531_s24   ;;  %s1101_s23 = sphi %s1170_s23, %s1530_s23   ;;  %s1097_s22 = sphi %s1168_s22, %s1529_s22   ;;  %s1093_s21 = sphi %s1166_s21, %s1528_s21  }
   0xa   : > { %p61_p0 = scmp.ne.s32.totalorder %s1097_s22, %s1093_s21  ;;  %p1510_p1 = scmp.eq.s32.totalorder %s1197_s27, 0 }
   0xb   : > { %p166_p3 = scmp.eq.s32.totalorder %s1511_s28, 1  ;;  %p741_p5 = scmp.ge.s32.totalorder %s1113_s26, 1 }
   0xc   : > { %p1208_p4 = por %p1510_p1, %p61_p0  ;;  %p229_p7 = scmp.lt.s32.totalorder %s1113_s26, 3 }
   0xd   : > { %p1213_p6 = por %p166_p3, %p61_p0  ;;  %s1115_s8 = smov [#allocation5]  }
   0xe   : > { %s1514_s29 = scalar_select %p1208_p4, 1, 0 }
   0xf   : > { %s1515_s30 = scalar_select %p1213_p6, 1, 0 }
  0x10   : > { %p1218_p8 = pnand %p741_p5, %p229_p7  ;;  %s241_s9 = sshll.u32 %s1115_s8, 4  ;;  %s1222_s9 = int_to_ptr.vmem [resolvable:$true] %s241_s9 }
  0x11   : > { %s1116_s11 = smov [#allocation7]   ;;  %s881_s15 = scalar_lea.hbm %s1504_s1, 512 }
  0x12   : > { %p788_p9 = pneg %p1218_p8  ;;  %s257_s12 = sshll.u32 %s1116_s11, 4  ;;  %s1233_s12 = int_to_ptr.vmem [resolvable:$true] %s257_s12 }
  0x13   : > { %p882_p12 = scmp.ne.s32.totalorder %s1504_s1, %s881_s15  ;;  %p888_p5 = scmp.lt.u32.totalorder %s881_s15, %s1504_s1 }
  0x14   : > { %p1229_p11 = pnand %p788_p9, %p1510_p1 }
  0x16   : > { %p883_p13 = pneg %p1229_p11 }
  0x18   : > { %p884_p0 = pnand %p883_p13, %p882_p12 }
  0x1a   : > { %p885_p3 = pneg %p884_p0 }
  0x1c   : > { %p890_p7 = pnand %p888_p5, %p885_p3 }
  0x1e   : > { %893 = shalt.err (!%p890_p7)
}
  0x1f   : > { %s894_s20 = scalar_lea.vmem %s1222_s9, 512  ;;  %p902_p2 = scmp.lt.s32.totalorder %s1222_s9, %s1222_s9 }
  0x20   : > { %p895_p9 = scmp.ne.s32.totalorder %s1222_s9, %s894_s20  ;;  %p903_p12 = scmp.lt.s32.totalorder %s894_s20, %s894_s20 }
  0x22   : > { %p897_p10 = pnand %p895_p9, %p883_p13  ;;  %p904_p0 = por %p903_p12, %p902_p2 }
  0x24   : > { %p898_p1 = pneg %p897_p10 }
  0x26   : > { %p905_p6 = pnand %p904_p0, %p898_p1 }
  0x28   : > { %908 = shalt.err (!%p905_p6)
}
  0x29   : > { %s1117_s8 = smov 128   ;;  %s1118_s11 = smov 8  }
  0x2a   : > { %791 = dma.hbm_to_vmem [thread:$0]  (!%p1229_p11), %s1504_s1, 512, %s1222_s9, [#allocation6], %s1117_s8, %s1117_s8, %s1118_s11  }
  0x2b   : > { %s909_s17 = scalar_lea.hbm %s1505_s2, 128 }
  0x2c   : > { %p910_p2 = scmp.ne.s32.totalorder %s1505_s2, %s909_s17  ;;  %p916_p10 = scmp.lt.u32.totalorder %s909_s17, %s1505_s2 }
  0x2e   : > { %p912_p1 = pnand %p910_p2, %p883_p13 }
  0x30   : > { %p913_p6 = pneg %p912_p1 }
  0x32   : > { %p918_p3 = pnand %p916_p10, %p913_p6 }
  0x34   : > { %921 = shalt.err (!%p918_p3)
}
  0x35   : > { %s922_s9 = scalar_lea.vmem %s1233_s12, 128  ;;  %p930_p12 = scmp.lt.s32.totalorder %s1233_s12, %s1233_s12 }
  0x36   : > { %p923_p5 = scmp.ne.s32.totalorder %s1233_s12, %s922_s9  ;;  %p931_p0 = scmp.lt.s32.totalorder %s922_s9, %s922_s9 }
  0x38   : > { %p925_p7 = pnand %p923_p5, %p883_p13  ;;  %p932_p2 = por %p931_p0, %p930_p12 }
  0x3a   : > { %p926_p9 = pneg %p925_p7 }
  0x3c   : > { %p933_p1 = pnand %p932_p2, %p926_p9 }
  0x3e   : > { %936 = shalt.err (!%p933_p1)
}
  0x3f   : > { %794 = dma.hbm_to_vmem [thread:$0]  (!%p1229_p11), %s1505_s2, 128, %s1233_s12, [#allocation6]  }
  0x40   : > { %s39_s11 = sadd.s32 1, %s1109_s25  ;;  %s48_s13 = sadd.s32 1, %s1101_s23 }
  0x41   : > { %p41_p13 = scmp.ge.s32.totalorder %s39_s11, 2  ;;  %p55_p6 = scmp.ne.s32.totalorder %s1101_s23, %s1097_s22 }
  0x42   : > { %p56_p10 = scmp.eq.s32.totalorder %s1113_s26, 0  ;;  %p811_p3 = scmp.lt.s32.totalorder %s1113_s26, 2 }
  0x43   : > { %s1534_s11 = smov (%p41_p13, %s39_s11), 0  ;;  %p1518_p7 = scmp.eq.s32.totalorder %s1197_s27, 1 }
  0x44   : > { %p57_p5 = por %p56_p10, %p55_p6  ;;  %s43_s14 = ssub.s32 %s1109_s25, %s1534_s11 }
  0x45   : > { %p1297_p9 = por %p1518_p7, %p55_p6  ;;  %s275_s15 = sand.u32 1, %s1101_s23  }
  0x46   : > { %p46_p12 = scmp.eq.s32.totalorder %s43_s14, 0  ;;  %s746_s12 = sshll.u32 %s275_s15, 2 }
  0x47   : > { %s1519_s10 = scalar_select %p1297_p9, 1, 0 }
  0x48   : > { %s747_s16 = sshll.u32 %s1109_s25, 6  ;;  %s279_s9 = scalar_lea.vmem [#allocation2], %s746_s12 }
  0x49   : > { %s1306_s17 = scalar_select %p46_p12, %s1101_s23, %s48_s13  }
  0x4a   : > { %s1311_s20 = scalar_lea.hbm %s1503_s0, %s747_s16  ;;  %s287_s28 = sshll.u32 %s279_s9, 4  ;;  %s1319_s28 = int_to_ptr.vmem [resolvable:$true] %s287_s28 }
  0x4b   : > { %p1315_p11 = pnand %p811_p3, %p57_p5  ;;  %s276_s13 = scalar_lea.sflag [#allocation3], %s275_s15 }
  0x4c   : > { %s937_s14 = scalar_lea.hbm %s1311_s20, 64  ;;  %s942_s18 = scalar_lea.hbm %s1503_s0, 128 }
  0x4d   : > { %p938_p0 = scmp.ne.s32.totalorder %s1311_s20, %s937_s14  ;;  %p939_p2 = pneg %p1315_p11 }
  0x4e   : > { %p943_p6 = scmp.lt.u32.totalorder %s1311_s20, %s1503_s0  ;;  %p944_p10 = scmp.lt.u32.totalorder %s942_s18, %s937_s14 }
  0x4f   : > { %p940_p1 = pnand %p939_p2, %p938_p0  ;;  %p946_p5 = scmp.lt.u32.totalorder %s937_s14, %s1311_s20 }
  0x50   : > { %p945_p3 = por %p944_p10, %p943_p6 }
  0x51   : > { %p941_p13 = pneg %p940_p1 }
  0x52   : > { %p947_p7 = por %p946_p5, %p945_p3 }
  0x54   : > { %p948_p12 = pnand %p947_p7, %p941_p13 }
  0x56   : > { %951 = shalt.err (!%p948_p12)
}
  0x57   : > { %s952_s15 = scalar_lea.vmem %s1319_s28, 64  ;;  %s1119_s12 = smov [#allocation2]  }
  0x58   : > { %p953_p0 = scmp.ne.s32.totalorder %s1319_s28, %s952_s15  ;;  %s957_s16 = sshll.u32 %s1119_s12, 4  ;;  %s958_s16 = int_to_ptr.vmem [resolvable:$false] %s957_s16 }
  0x59   : > { %s959_s19 = scalar_lea.vmem %s958_s16, 128  ;;  %p960_p4 = scmp.lt.s32.totalorder %s1319_s28, %s958_s16 }
  0x5a   : > { %p955_p1 = pnand %p953_p0, %p939_p2  ;;  %p961_p6 = scmp.lt.s32.totalorder %s959_s19, %s952_s15 }
  0x5c   : > { %p956_p9 = pneg %p955_p1  ;;  %p962_p10 = por %p961_p6, %p960_p4 }
  0x5e   : > { %p963_p3 = pnand %p962_p10, %p956_p9 }
  0x60   : > { %966 = shalt.err (!%p963_p3)
}
  0x61   : > { %798 = dma.hbm_to_vmem [thread:$0]  (!%p1315_p11), %s1311_s20, 64, %s1319_s28, %s276_s13  }
  0x62   : > { %296 = sbr.rel (%p1218_p8) target bundleno = 723 (0x2d3), region = 36  ;;  %s1349_s14 = sand.u32 (!%p1218_p8), 1, %s1097_s22  }
  0x63   : > { %s1352_s18 = sshll.u32 (!%p1218_p8), %s1349_s14, 2  ;;  %s299_s9 = scalar_lea.sflag (!%p1218_p8), [#allocation3], %s1349_s14 }
  0x64   : > { %s302_s15 = scalar_lea.vmem (!%p1218_p8), [#allocation2], %s1352_s18  ;;  %p1521_p4 = scmp.ne.s32.totalorder (!%p1218_p8), %s1514_s29, 0 }
  0x69   : > { %1076 = dma.done.wait (%p1521_p4), %s299_s9, 64  }
  0x6a   : > { %1078 = vsyncadd (%p1521_p4), %s299_s9, 4294967232  ;;  %p1522_p9 = scmp.eq.s32.totalorder %s1197_s27, 0 }
  0x6c   : > { %1080 = dma.done.wait (%p1522_p9), [#allocation6], 640   ;;  %p1523_p8 = pmov %p1522_p9 }
  0x6d   : > { %v1120_v0 = vmov 0   ;;  %v875_v1 = vld [vmem:[#allocation5 + $0x4] ss:$8 sps:$4 sm:$0xff]   ;;  %v877_v2 = vld [vmem:[#allocation5] ss:$8 sps:$4 sm:$0xff]   ;;  %vm383_vm0 = vcmask 261120  }
  0x6e   : > { %1082 = vsyncadd (%p1523_p8), [#allocation6], 4294966656  ;;  %419 = vmatprep.mubr.bf16.mxu0 %v1120_v0  ;;  %387 = vmatprep.subr.bf16.mxu0 %v875_v1  ;;  %v878_v3 = vld [vmem:[#allocation5 + $0x14] ss:$8 sps:$4 sm:$0xff]   ;;  %v880_v4 = vld [vmem:[#allocation5 + $0x10] ss:$8 sps:$4 sm:$0xff]  }
  0x6f   : > { %388 = vmatpush1.bf16.msra.mxu0 %v877_v2  ;;  %v358_v5 = vld [vmem:[%s302_s15] sm:$0xf]  ;;  %s1121_s29 = smov 16   ;;  %s1122_s7 = smov 48   ;;  %vm505_vm1 = vcmask 519168   ;;  %v428_v11 = vld [vmem:[#allocation7] sm:$0xff] }
  0x70   : > { %389 = vmatprep.subr.bf16.mxu0 %v878_v3  ;;  %s352_s20 = scalar_lea.vmem [#allocation11], %s1352_s18  ;;  %s1123_s28 = smov 64   ;;  %vm438_vm2 = vcmask 130048   ;;  %v429_v12 = vld [vmem:[%s1506_s3] sm:$0xff]  ;;  %vm443_vm3 = vcmask 257024   ;;  %vm483_vm4 = vcmask 519424  }
  0x71   : > { %s1124_s8 = smov 80   ;;  %s1125_s13 = smov 96  }
  0x72   : > { %s1126_s12 = smov 112   ;;  %s1127_s9 = smov 32  }
  0x73   : > { %390 = vmatpush1.bf16.msra.mxu0 %v880_v4  ;;  %s338_s15 = scalar_lea.vmem [#allocation8], %s1352_s18  ;;  %p1524_p2 = scmp.ne.s32.totalorder %s1519_s10, 0 }
  0x74   : > { %s1128_s16 = smov [#allocation8]  }
  0x75   : > { %s971_s19 = sshll.u32 %s1128_s16, 4  ;;  %s972_s19 = int_to_ptr.vmem [resolvable:$false] %s971_s19 }
  0x76   : > { %759 = vmatmul.mubr.msk.bf16.vlgmr.msra.gmra.mrb[0].mxu0 %vm383_vm0, %v358_v5 }
 0x149   : > { %v421_v6 = vpop.f32.mrb[0].mxu0 }
 0x14a   : > { %435 = vrot.lane.b32.xlu1 %v421_v6, %s1121_s29  ;;  %450 = vrot.lane.b32.xlu0 %v421_v6, %s1122_s7  ;;  %v423_v7 = vpop.f32.mrb[1].mxu0  ;;  %v430_v23 = vmul.f32 %v428_v11, %v421_v6  ;;  %s1377_s29 = sshll.u32 %s1105_s24, 6  ;;  %s532_s7 = sshll.u32 %s338_s15, 4  ;;  %s1385_s7 = int_to_ptr.vmem [resolvable:$true] %s532_s7 }
 0x14b   : > { %v504_v8 = vpack.c.bf16 %v423_v7, %v423_v7  ;;  %v425_v9 = vpop.f32.mrb[2].mxu0  ;;  %s967_s24 = scalar_lea.vmem %s1385_s7, 64  ;;  %p974_p7 = scmp.lt.s32.totalorder %s1385_s7, %s972_s19 }
 0x14c   : > { %v426_v10 = vpop.f32.mrb[3].mxu0  ;;  %p968_p11 = scmp.ne.s32.totalorder %s1385_s7, %s967_s24 }
 0x14d   : > { %506 = vst.msk [vmem:[%s352_s20] sm:$0xf] %vm505_vm1, %v504_v8 }
 0x14e   : > { %446 = vrot.lane.b32.xlu1 %v428_v11, %s1123_s28  ;;  %453 = vrot.lane.b32.xlu0 %v421_v6, %s1124_s8  ;;  %p969_p13 = pnand %p968_p11, %p1524_p2 }
 0x150   : > { %p970_p5 = pneg %p969_p13 }
 0x152   : > { %485 = vrot.lane.b32.xlu1 %v428_v11, %s1125_s13  ;;  %432 = vrot.lane.b32.xlu0 %v421_v6, %s1126_s12  ;;  %s1383_s12 = scalar_lea.hbm %s1507_s4, %s1377_s29 }
 0x1bc   : > { %v436_v13 = vpop.permute.xlu1 %435  ;;  %v451_v14 = vpop.permute.xlu0 %450 }
 0x1bd   : > { %v489_v15 = vsel %vm438_vm2, %v436_v13, %v451_v14 }
 0x1be   : > { %v490_v16 = vmul.f32 %v489_v15, %v429_v12 }
 0x1c0   : > { %492 = vrot.lane.b32.xlu1 %v490_v16, %s1125_s13  ;;  %v454_v17 = vpop.permute.xlu0 %453  ;;  %v447_v28 = vpop.permute.xlu1 %446 }
 0x1c1   : > { %v456_v18 = vsel %vm438_vm2, %v451_v14, %v454_v17  ;;  %v449_v33 = vmul.f32 %v447_v28, %v421_v6 }
 0x1c2   : > { %v457_v19 = vmul.f32 %v456_v18, %v429_v12 }
 0x1c4   : > { %459 = vrot.lane.b32.xlu0 %v457_v19, %s1123_s28  ;;  %v433_v20 = vpop.permute.xlu0 %432  ;;  %v486_v29 = vpop.permute.xlu1 %485 }
 0x1c5   : > { %v439_v21 = vsel %vm438_vm2, %v433_v20, %v436_v13  ;;  %v475_v22 = vsel %vm438_vm2, %v454_v17, %v433_v20  ;;  %v488_v30 = vmul.f32 %v486_v29, %v421_v6 }
 0x1c6   : > { %v440_v24 = vmul.f32 %v439_v21, %v429_v12  ;;  %v476_v25 = vmul.f32 %v475_v22, %v429_v12 }
 0x1c8   : > { %v441_v26 = vadd.f32 %v440_v24, %v430_v23  ;;  %471 = vrot.lane.b32.xlu0 %v428_v11, %s1127_s9  ;;  %478 = vrot.lane.b32.xlu1 %v476_v25, %s1127_s9  ;;  %s973_s9 = scalar_lea.vmem %s972_s19, 128 }
 0x1c9   : > { %p975_p12 = scmp.lt.s32.totalorder %s973_s9, %s967_s24 }
 0x1ca   : > { %v442_v27 = vpack.c.bf16 %v441_v26, %v441_v26 }
 0x1cb   : > { %p976_p0 = por %p975_p12, %p974_p7 }
 0x1cc   : > { %444 = vst.msk [vmem:[%s338_s15] sm:$0xf] %vm443_vm3, %v442_v27 }
 0x1cd   : > { %p977_p1 = pnand %p976_p0, %p970_p5 }
 0x232   : > { %v493_v31 = vpop.permute.xlu1 %492 }
 0x233   : > { %v495_v32 = vadd.f32 %v493_v31, %v488_v30 }
 0x235   : > { %v771_v34 = vpack.c.bf16 %v495_v32, %v495_v32 }
 0x236   : > { %v460_v35 = vpop.permute.xlu0 %459 }
 0x237   : > { %v462_v36 = vadd.f32 %v460_v35, %v449_v33  ;;  %500 = vrot.lane.b32.xlu1 %v771_v34, %s1123_s28 }
 0x239   : > { %v770_v37 = vpack.c.bf16 %v462_v36, %v462_v36 }
 0x23a   : > { %v472_v38 = vpop.permute.xlu0 %471  ;;  %v479_v40 = vpop.permute.xlu1 %478 }
 0x23b   : > { %v474_v39 = vmul.f32 %v472_v38, %v421_v6  ;;  %467 = vrot.lane.b32.xlu0 %v770_v37, %s1123_s28  ;;  %s508_s28 = scalar_lea.sflag [#allocation4], %s1349_s14 }
 0x23d   : > { %v481_v41 = vadd.f32 %v479_v40, %v474_v39 }
 0x23f   : > { %v482_v42 = vpack.c.bf16 %v481_v41, %v481_v41 }
 0x241   : > { %484 = vst.msk [vmem:[%s338_s15] sm:$0xf] %vm483_vm4, %v482_v42 }
 0x242   : > { %980 = shalt.err (!%p977_p1)
}
 0x243   : > { %s981_s14 = scalar_lea.hbm %s1383_s12, 64  ;;  %s985_s13 = scalar_lea.hbm %s1507_s4, 128 }
 0x244   : > { %p982_p6 = scmp.ne.s32.totalorder %s1383_s12, %s981_s14  ;;  %p986_p4 = scmp.lt.u32.totalorder %s1383_s12, %s1507_s4 }
 0x245   : > { %p987_p9 = scmp.lt.u32.totalorder %s985_s13, %s981_s14  ;;  %p989_p11 = scmp.lt.u32.totalorder %s981_s14, %s1383_s12 }
 0x246   : > { %p983_p10 = pnand %p982_p6, %p1524_p2 }
 0x247   : > { %p988_p8 = por %p987_p9, %p986_p4 }
 0x248   : > { %p984_p3 = pneg %p983_p10 }
 0x249   : > { %p990_p13 = por %p989_p11, %p988_p8 }
 0x24b   : > { %p991_p5 = pnand %p990_p13, %p984_p3 }
 0x24d   : > { %994 = shalt.err (!%p991_p5)
}
 0x24e   : > { %782 = dma.vmem_to_hbm [thread:$0]  (%p1524_p2), %s1385_s7, 64, %s1383_s12, %s508_s28  }
 0x24f   : > { %s512_s24 = sand.u32 1, %s1197_s27   ;;  %s345_s9 = scalar_lea.vmem [#allocation9], %s1352_s18 }
 0x250   : > { %s546_s15 = sshll.u32 %s345_s9, 4  ;;  %s560_s8 = sshll.u32 %s352_s20, 4  ;;  %s1420_s15 = int_to_ptr.vmem [resolvable:$true] %s546_s15  ;;  %s1429_s8 = int_to_ptr.vmem [resolvable:$true] %s560_s8 }
 0x251   : > { %s1418_s16 = scalar_lea.hbm %s1508_s5, %s1377_s29  ;;  %s1427_s12 = scalar_lea.hbm %s1509_s6, %s1377_s29 }
 0x252   : > { %s1432_s18 = scalar_lea.sflag [#allocation10], %s512_s24  ;;  %s995_s20 = scalar_lea.vmem %s1420_s15, 64 }
 0x253   : > { %p996_p7 = scmp.ne.s32.totalorder %s1420_s15, %s995_s20  ;;  %s1129_s28 = smov [#allocation9]  }
 0x254   : > { %s999_s19 = sshll.u32 %s1129_s28, 4  ;;  %s1000_s19 = int_to_ptr.vmem [resolvable:$false] %s999_s19 }
 0x255   : > { %p997_p12 = pnand %p996_p7, %p1524_p2  ;;  %s1001_s14 = scalar_lea.vmem %s1000_s19, 128 }
 0x256   : > { %p1002_p1 = scmp.lt.s32.totalorder %s1420_s15, %s1000_s19  ;;  %p1003_p6 = scmp.lt.s32.totalorder %s1001_s14, %s995_s20 }
 0x257   : > { %p998_p0 = pneg %p997_p12 }
 0x258   : > { %p1004_p10 = por %p1003_p6, %p1002_p1 }
 0x25a   : > { %p1005_p3 = pnand %p1004_p10, %p998_p0 }
 0x2a9   : > { %v501_v44 = vpop.permute.xlu1 %500 }
 0x2ad   : > { %v468_v43 = vpop.permute.xlu0 %467 }
 0x2ae   : > { %470 = vst.msk [vmem:[%s345_s9] sm:$0xf] %vm443_vm3, %v468_v43 }
 0x2af   : > { %503 = vst.msk [vmem:[%s345_s9] sm:$0xf] %vm483_vm4, %v501_v44 }
 0x2b0   : > { %1008 = shalt.err (!%p1005_p3)
}
 0x2b1   : > { %s1009_s29 = scalar_lea.hbm %s1418_s16, 64  ;;  %s1013_s13 = scalar_lea.hbm %s1508_s5, 128 }
 0x2b2   : > { %p1010_p4 = scmp.ne.s32.totalorder %s1418_s16, %s1009_s29  ;;  %p1014_p11 = scmp.lt.u32.totalorder %s1418_s16, %s1508_s5 }
 0x2b3   : > { %p1015_p13 = scmp.lt.u32.totalorder %s1013_s13, %s1009_s29  ;;  %p1017_p7 = scmp.lt.u32.totalorder %s1009_s29, %s1418_s16 }
 0x2b4   : > { %p1011_p9 = pnand %p1010_p4, %p1524_p2 }
 0x2b5   : > { %p1016_p5 = por %p1015_p13, %p1014_p11 }
 0x2b6   : > { %p1012_p8 = pneg %p1011_p9 }
 0x2b7   : > { %p1018_p12 = por %p1017_p7, %p1016_p5 }
 0x2b9   : > { %p1019_p0 = pnand %p1018_p12, %p1012_p8 }
 0x2bb   : > { %1022 = shalt.err (!%p1019_p0)
}
 0x2bc   : > { %783 = dma.vmem_to_hbm [thread:$0]  (%p1524_p2), %s1420_s15, 64, %s1418_s16, %s1432_s18  }
 0x2bd   : > { %s1023_s20 = scalar_lea.vmem %s1429_s8, 64  ;;  %s1130_s28 = smov [#allocation11]  }
 0x2be   : > { %p1024_p1 = scmp.ne.s32.totalorder %s1429_s8, %s1023_s20  ;;  %s1027_s19 = sshll.u32 %s1130_s28, 4  ;;  %s1028_s19 = int_to_ptr.vmem [resolvable:$false] %s1027_s19 }
 0x2bf   : > { %s1029_s14 = scalar_lea.vmem %s1028_s19, 128  ;;  %p1030_p3 = scmp.lt.s32.totalorder %s1429_s8, %s1028_s19 }
 0x2c0   : > { %p1025_p6 = pnand %p1024_p1, %p1524_p2  ;;  %p1031_p4 = scmp.lt.s32.totalorder %s1029_s14, %s1023_s20 }
 0x2c2   : > { %p1026_p10 = pneg %p1025_p6  ;;  %p1032_p9 = por %p1031_p4, %p1030_p3 }
 0x2c4   : > { %p1033_p8 = pnand %p1032_p9, %p1026_p10 }
 0x2c6   : > { %1036 = shalt.err (!%p1033_p8)
}
 0x2c7   : > { %s1037_s15 = scalar_lea.hbm %s1427_s12, 64  ;;  %s1041_s24 = scalar_lea.hbm %s1509_s6, 128 }
 0x2c8   : > { %p1038_p11 = scmp.ne.s32.totalorder %s1427_s12, %s1037_s15  ;;  %p1042_p7 = scmp.lt.u32.totalorder %s1427_s12, %s1509_s6 }
 0x2c9   : > { %p1043_p12 = scmp.lt.u32.totalorder %s1041_s24, %s1037_s15  ;;  %p1045_p1 = scmp.lt.u32.totalorder %s1037_s15, %s1427_s12 }
 0x2ca   : > { %p1039_p13 = pnand %p1038_p11, %p1524_p2 }
 0x2cb   : > { %p1044_p0 = por %p1043_p12, %p1042_p7 }
 0x2cc   : > { %p1040_p5 = pneg %p1039_p13 }
 0x2cd   : > { %p1046_p6 = por %p1045_p1, %p1044_p0 }
 0x2cf   : > { %p1047_p10 = pnand %p1046_p6, %p1040_p5 }
 0x2d1   : > { %1050 = shalt.err (!%p1047_p10)
}
 0x2d2   : > { %784 = dma.vmem_to_hbm [thread:$0]  (%p1524_p2), %s1429_s8, 64, %s1427_s12, %s1432_s18  }
 0x2d3 PF: > { %s572_s7 = sand.u32 1, %s1093_s21   ;;  %p1525_p3 = scmp.ne.s32.totalorder %s1515_s30, 0 }
 0x2d4   : > { %p1526_p4 = scmp.ge.s32.totalorder %s1113_s26, 2  ;;  %s573_s27 = scalar_lea.sflag [#allocation4], %s572_s7 }
 0x2d6   : > { %p800_p9 = pnand %p1526_p4, %p1525_p3 }
 0x2d8   : > { %1084 = dma.done.wait (!%p800_p9), %s573_s27, 64  }
 0x2d9   : > { %1086 = vsyncadd (!%p800_p9), %s573_s27, 4294967232  ;;  %s1527_s20 = sadd.s32 4294967294, %s1113_s26  }
 0x2da   : > { %s581_s28 = sand.u32 1, %s1527_s20  }
 0x2db   : > { %s582_s19 = scalar_lea.sflag [#allocation10], %s581_s28 }
 0x2dc   : > { %1088 = dma.done.wait (!%p800_p9), %s582_s19, 128  }
 0x2dd   : > { %1090 = vsyncadd (!%p800_p9), %s582_s19, 4294967168  ;;  %s27_s26 = sadd.s32 1, %s1113_s26   ;;  %s1528_s21 = smov %s1097_s22 }
 0x2de   : > { %p24_p2 = scmp.ge.s32.totalorder %s27_s26, 4   ;;  %s1529_s22 = smov %s1101_s23 }
 0x2df   : > { %s1530_s23 = smov %s1306_s17  ;;  %s1531_s24 = smov %s1109_s25 }
 0x2e0   : > { %s1532_s25 = smov %s1534_s11  ;;  %26 = sbr.rel (!%p24_p2) target bundleno = 9 (0x9), region = 125 }
 0x2e7   :  { %596 = vsyncpa [#allocation3], 1 }
 0x2e8   :  { %598 = vsyncpa [#allocation3 + $0x1], 1 }
 0x2e9   :  { %599 = vsyncpa [#allocation6], 1 }
 0x2ea   :  { %600 = vsyncpa [#allocation4], 1 }
 0x2eb   :  { %602 = vsyncpa [#allocation4 + $0x1], 1 }
 0x2ec   :  { %603 = vsyncpa [#allocation10], 1 }
 0x2ed   :  { %605 = vsyncpa [#allocation10 + $0x1], 1 }

</bundles_post_ra>
